<compile_context>
chip_gen: v6e
topology: v6e:2x2x1
jax: 0.10.0
libtpu: 0.0.40
codegen_flags: <defaults>
</compile_context>

<pallas_src>
import math
import functools

import jax
import jax.numpy as jnp
from jax.experimental import pallas as pl
from jax.experimental.pallas import tpu as pltpu

_INV_SQRT2 = 1.0 / math.sqrt(2.0)


def _residual_block_kernel(
    x_ref,      # (C, tT)     corrupted-input tile (channels on sublanes, T on lanes)
    mts_ref,    # (E, tT)     observed-MTS embedding tile
    bgf_ref,    # (2, C, 1)   per-batch [gate, filter] bias (diffusion proj folded in)
    wx_ref,     # (2, C, C)   [gate, filter] halves of W_mid^T
    wm_ref,     # (2, C, E)   [gate, filter] halves of W_cond^T
    wo_ref,     # (2, C, C)   [residual, skip] halves of W_out^T
    bo_ref,     # (2, C, 1)   [residual, skip] bias
    out_ref,    # (C, tT)     (x + residual) / sqrt(2)
    skip_ref,   # (C, tT)     skip connection
):
    x = x_ref[...].astype(jnp.float32)          # (C, tT)
    m = mts_ref[...].astype(jnp.float32)        # (E, tT)

    gate = (jnp.dot(wx_ref[0], x, preferred_element_type=jnp.float32)
            + jnp.dot(wm_ref[0], m, preferred_element_type=jnp.float32)
            + bgf_ref[0])
    filt = (jnp.dot(wx_ref[1], x, preferred_element_type=jnp.float32)
            + jnp.dot(wm_ref[1], m, preferred_element_type=jnp.float32)
            + bgf_ref[1])
    y = jax.nn.sigmoid(gate) * jnp.tanh(filt)   # (C, tT)

    residual = jnp.dot(wo_ref[0], y, preferred_element_type=jnp.float32) + bo_ref[0]
    skip = jnp.dot(wo_ref[1], y, preferred_element_type=jnp.float32) + bo_ref[1]

    out_ref[...] = ((x + residual) * _INV_SQRT2).astype(out_ref.dtype)
    skip_ref[...] = skip.astype(skip_ref.dtype)


def _choose_tile(T, tile_t):
    """Largest lane-dense tile: either all of T, or a 128-multiple dividing T."""
    if T <= tile_t:
        return T
    t = (tile_t // 128) * 128
    while t >= 128:
        if T % t == 0:
            return t
        t -= 128
    return T  # fall back: single tile covering T


def residual_block_pallas(x, mts_emb, diffusion_emb, params, *, tile_t=2048):
    """x:(B,C,K,L)  mts_emb:(B,E,K,L)  diffusion_emb:(B,D) -> ((B,C,K,L),(B,C,K,L))."""
    B, C, K, L = x.shape
    _, E, _, _ = mts_emb.shape
    T = K * L
    tT = _choose_tile(T, tile_t)
    nT = T // tT

    # Free reshapes only (no HBM transposes): native channels-first layout.
    x_ct = x.reshape(B, C, T)
    mts_ct = mts_emb.reshape(B, E, T)

    f32 = jnp.float32
    # Fold the diffusion projection into a per-batch effective bias:
    #   (x + dproj) @ Wm = x @ Wm + dproj @ Wm
    dproj = diffusion_emb.astype(f32) @ params["w_diff"] + params["b_diff"][0]   # (B, C)
    b_pre = dproj @ params["w_mid"] + params["b_mid"][0] + params["b_cond"][0]   # (B, 2C)
    bgf = jnp.stack([b_pre[:, :C], b_pre[:, C:]], axis=1)[..., None]             # (B, 2, C, 1)

    # Weights to (out, in) layout and pre-split the 2C outputs into stacked
    # halves so the kernel never slices across a sublane group.
    wm_t = params["w_mid"].T      # (2C, C)
    wc_t = params["w_cond"].T     # (2C, E)
    wo_t = params["w_out"].T      # (2C, C)
    wx = jnp.stack([wm_t[:C], wm_t[C:]])          # (2, C, C)  gate / filter
    wm = jnp.stack([wc_t[:C], wc_t[C:]])          # (2, C, E)  gate / filter
    wo = jnp.stack([wo_t[:C], wo_t[C:]])          # (2, C, C)  residual / skip
    bo_full = params["b_out"][0]                  # (2C,)
    bo = jnp.stack([bo_full[:C], bo_full[C:]])[..., None]      # (2, C, 1)

    full = lambda a: pl.BlockSpec(a.shape, lambda b, t: (0,) * a.ndim)

    out_ct, skip_ct = pl.pallas_call(
        _residual_block_kernel,
        out_shape=(
            jax.ShapeDtypeStruct((B, C, T), x.dtype),
            jax.ShapeDtypeStruct((B, C, T), x.dtype),
        ),
        grid=(B, nT),
        in_specs=[
            pl.BlockSpec((None, C, tT), lambda b, t: (b, 0, t)),      # x tile
            pl.BlockSpec((None, E, tT), lambda b, t: (b, 0, t)),      # mts tile
            pl.BlockSpec((None, 2, C, 1), lambda b, t: (b, 0, 0, 0)), # per-batch bias
            full(wx), full(wm), full(wo), full(bo),
        ],
        out_specs=[
            pl.BlockSpec((None, C, tT), lambda b, t: (b, 0, t)),
            pl.BlockSpec((None, C, tT), lambda b, t: (b, 0, t)),
        ],
        compiler_params=pltpu.CompilerParams(
            dimension_semantics=("parallel", "parallel"),
            vmem_limit_bytes=32 * 1024 * 1024),
    )(x_ct, mts_ct, bgf, wx, wm, wo, bo)

    out = out_ct.reshape(B, C, K, L)
    skip = skip_ct.reshape(B, C, K, L)
    return out, skip


def residual_block_ref(x, mts_emb, diffusion_emb, params):
    """Pure-JAX reference mirroring the PyTorch forward."""
    B, C, K, L = x.shape
    T = K * L
    xf = x.reshape(B, C, T)
    dproj = diffusion_emb @ params["w_diff"] + params["b_diff"][0]          # (B, C)
    y = xf + dproj[:, :, None]
    y = jnp.einsum("bit,io->bot", y, params["w_mid"]) + params["b_mid"][0][None, :, None]
    mts = mts_emb.reshape(B, -1, T)
    cond = jnp.einsum("bit,io->bot", mts, params["w_cond"]) + params["b_cond"][0][None, :, None]
    y = y + cond
    gate, filt = y[:, :C], y[:, C:]
    y = jax.nn.sigmoid(gate) * jnp.tanh(filt)
    y = jnp.einsum("bit,io->bot", y, params["w_out"]) + params["b_out"][0][None, :, None]
    residual, skip = y[:, :C], y[:, C:]
    out = (xf + residual) / math.sqrt(2.0)
    return out.reshape(B, C, K, L), skip.reshape(B, C, K, L)


def init_params(key, mts_emb_dim, channels, diffusion_embedding_dim):
    """Deterministic synthetic init (Kaiming-normal style for conv weights)."""
    ks = jax.random.split(key, 8)
    C, E, D = channels, mts_emb_dim, diffusion_embedding_dim

    def kaiming(k, fan_in, shape):
        return jax.random.normal(k, shape, jnp.float32) * math.sqrt(2.0 / fan_in)

    def bias(k, fan_in, shape):
        bound = 1.0 / math.sqrt(fan_in)
        return jax.random.uniform(k, shape, jnp.float32, -bound, bound)

    return {
        # Linear(D, C): stored as (D, C) so projection is emb @ W + b
        "w_diff": kaiming(ks[0], D, (D, C)),
        "b_diff": bias(ks[1], D, (1, C)),
        # Conv1d(C, 2C, 1): stored as (in, out) = conv_weight[:, :, 0].T
        "w_mid": kaiming(ks[2], C, (C, 2 * C)),
        "b_mid": bias(ks[3], C, (1, 2 * C)),
        # Conv1d(E, 2C, 1)
        "w_cond": kaiming(ks[4], E, (E, 2 * C)),
        "b_cond": bias(ks[5], E, (1, 2 * C)),
        # Conv1d(C, 2C, 1)
        "w_out": kaiming(ks[6], C, (C, 2 * C)),
        "b_out": bias(ks[7], C, (1, 2 * C)),
    }


if __name__ == "__main__":
    B, C, K, L = 2, 4, 16, 16          # batch, channels, features, time
    E, D = 8, 16                        # mts_emb_dim, diffusion_embedding_dim

    key = jax.random.PRNGKey(0)
    k_x, k_m, k_d, k_p = jax.random.split(key, 4)
    x = jax.random.normal(k_x, (B, C, K, L), jnp.float32)
    mts_emb = jax.random.normal(k_m, (B, E, K, L), jnp.float32)
    diffusion_emb = jax.random.normal(k_d, (B, D), jnp.float32)
    params = init_params(k_p, E, C, D)

    fn = jax.jit(functools.partial(residual_block_pallas, tile_t=2048))
    out, skip = fn(x, mts_emb, diffusion_emb, params)
    jax.block_until_ready((out, skip))

    out_ref, skip_ref = residual_block_ref(x, mts_emb, diffusion_emb, params)
    assert out.shape == (B, C, K, L) and skip.shape == (B, C, K, L)
    assert jnp.allclose(out, out_ref, atol=2e-5, rtol=2e-5)
    assert jnp.allclose(skip, skip_ref, atol=2e-5, rtol=2e-5)

    print("KERNEL_OK")
</pallas_src>

<mosaic_0001>
module attributes {stable_mosaic.version = 11 : i64} {
  func.func @_residual_block_kernel(%arg0: i32, %arg1: i32, %arg2: memref<1x4x256xf32, #tpu.memory_space<vmem>>, %arg3: memref<1x8x256xf32, #tpu.memory_space<vmem>>, %arg4: memref<1x2x4x1xf32, #tpu.memory_space<vmem>>, %arg5: memref<2x4x4xf32, #tpu.memory_space<vmem>>, %arg6: memref<2x4x8xf32, #tpu.memory_space<vmem>>, %arg7: memref<2x4x4xf32, #tpu.memory_space<vmem>>, %arg8: memref<2x4x1xf32, #tpu.memory_space<vmem>>, %arg9: memref<1x4x256xf32, #tpu.memory_space<vmem>>, %arg10: memref<1x4x256xf32, #tpu.memory_space<vmem>>) attributes {dimension_semantics = [#tpu.dimension_semantics<parallel>, #tpu.dimension_semantics<parallel>], iteration_bounds = array<i64: 2, 1>, scalar_prefetch = 0 : i64, scratch_operands = 0 : i64, tpu.core_type = #tpu.core_type<tc>, window_params = [{transform_indices = @transform_0, window_bounds = array<i64: 1, 4, 256>}, {transform_indices = @transform_1, window_bounds = array<i64: 1, 8, 256>}, {transform_indices = @transform_2, window_bounds = array<i64: 1, 2, 4, 1>}, {pipeline_mode = #tpu.pipeline_mode<synchronous>, transform_indices = @transform_3, window_bounds = array<i64: 2, 4, 4>}, {pipeline_mode = #tpu.pipeline_mode<synchronous>, transform_indices = @transform_4, window_bounds = array<i64: 2, 4, 8>}, {pipeline_mode = #tpu.pipeline_mode<synchronous>, transform_indices = @transform_5, window_bounds = array<i64: 2, 4, 4>}, {pipeline_mode = #tpu.pipeline_mode<synchronous>, transform_indices = @transform_6, window_bounds = array<i64: 2, 4, 1>}, {transform_indices = @transform_7, window_bounds = array<i64: 1, 4, 256>}, {transform_indices = @transform_8, window_bounds = array<i64: 1, 4, 256>}]} {
    %c0 = arith.constant 0 : index
    %c0_0 = arith.constant 0 : index
    %c0_1 = arith.constant 0 : index
    %0 = vector.load %arg2[%c0, %c0_0, %c0_1] : memref<1x4x256xf32, #tpu.memory_space<vmem>>, vector<1x4x256xf32>
    %1 = vector.shape_cast %0 : vector<1x4x256xf32> to vector<4x256xf32>
    %c0_2 = arith.constant 0 : index
    %c0_3 = arith.constant 0 : index
    %c0_4 = arith.constant 0 : index
    %2 = vector.load %arg3[%c0_2, %c0_3, %c0_4] : memref<1x8x256xf32, #tpu.memory_space<vmem>>, vector<1x8x256xf32>
    %3 = vector.shape_cast %2 : vector<1x8x256xf32> to vector<8x256xf32>
    %c0_5 = arith.constant 0 : index
    %c0_6 = arith.constant 0 : index
    %c0_7 = arith.constant 0 : index
    %4 = vector.load %arg5[%c0_5, %c0_6, %c0_7] : memref<2x4x4xf32, #tpu.memory_space<vmem>>, vector<1x4x4xf32>
    %5 = vector.shape_cast %4 : vector<1x4x4xf32> to vector<4x4xf32>
    %cst = arith.constant dense<0.000000e+00> : vector<4x256xf32>
    %6 = tpu.matmul %5, %1, %cst {dimension_numbers = #tpu.dot_dimension_numbers<[1], [0], [0], [1], [0, 0, 1, 1], [], []>} : vector<4x4xf32>, vector<4x256xf32>, vector<4x256xf32> -> vector<4x256xf32>
    %c0_8 = arith.constant 0 : index
    %c0_9 = arith.constant 0 : index
    %c0_10 = arith.constant 0 : index
    %7 = vector.load %arg6[%c0_8, %c0_9, %c0_10] : memref<2x4x8xf32, #tpu.memory_space<vmem>>, vector<1x4x8xf32>
    %8 = vector.shape_cast %7 : vector<1x4x8xf32> to vector<4x8xf32>
    %cst_11 = arith.constant dense<0.000000e+00> : vector<4x256xf32>
    %9 = tpu.matmul %8, %3, %cst_11 {dimension_numbers = #tpu.dot_dimension_numbers<[1], [0], [0], [1], [0, 0, 1, 1], [], []>} : vector<4x8xf32>, vector<8x256xf32>, vector<4x256xf32> -> vector<4x256xf32>
    %10 = arith.addf %6, %9 : vector<4x256xf32>
    %c0_12 = arith.constant 0 : index
    %c0_13 = arith.constant 0 : index
    %c0_14 = arith.constant 0 : index
    %c0_15 = arith.constant 0 : index
    %11 = vector.load %arg4[%c0_12, %c0_13, %c0_14, %c0_15] : memref<1x2x4x1xf32, #tpu.memory_space<vmem>>, vector<1x1x4x1xf32>
    %12 = vector.shape_cast %11 : vector<1x1x4x1xf32> to vector<4x1xf32>
    %13 = vector.broadcast %12 : vector<4x1xf32> to vector<4x256xf32>
    %14 = arith.addf %10, %13 : vector<4x256xf32>
    %c1 = arith.constant 1 : index
    %c0_16 = arith.constant 0 : index
    %c0_17 = arith.constant 0 : index
    %15 = vector.load %arg5[%c1, %c0_16, %c0_17] : memref<2x4x4xf32, #tpu.memory_space<vmem>>, vector<1x4x4xf32>
    %16 = vector.shape_cast %15 : vector<1x4x4xf32> to vector<4x4xf32>
    %cst_18 = arith.constant dense<0.000000e+00> : vector<4x256xf32>
    %17 = tpu.matmul %16, %1, %cst_18 {dimension_numbers = #tpu.dot_dimension_numbers<[1], [0], [0], [1], [0, 0, 1, 1], [], []>} : vector<4x4xf32>, vector<4x256xf32>, vector<4x256xf32> -> vector<4x256xf32>
    %c1_19 = arith.constant 1 : index
    %c0_20 = arith.constant 0 : index
    %c0_21 = arith.constant 0 : index
    %18 = vector.load %arg6[%c1_19, %c0_20, %c0_21] : memref<2x4x8xf32, #tpu.memory_space<vmem>>, vector<1x4x8xf32>
    %19 = vector.shape_cast %18 : vector<1x4x8xf32> to vector<4x8xf32>
    %cst_22 = arith.constant dense<0.000000e+00> : vector<4x256xf32>
    %20 = tpu.matmul %19, %3, %cst_22 {dimension_numbers = #tpu.dot_dimension_numbers<[1], [0], [0], [1], [0, 0, 1, 1], [], []>} : vector<4x8xf32>, vector<8x256xf32>, vector<4x256xf32> -> vector<4x256xf32>
    %21 = arith.addf %17, %20 : vector<4x256xf32>
    %c0_23 = arith.constant 0 : index
    %c1_24 = arith.constant 1 : index
    %c0_25 = arith.constant 0 : index
    %c0_26 = arith.constant 0 : index
    %22 = vector.load %arg4[%c0_23, %c1_24, %c0_25, %c0_26] : memref<1x2x4x1xf32, #tpu.memory_space<vmem>>, vector<1x1x4x1xf32>
    %23 = vector.shape_cast %22 : vector<1x1x4x1xf32> to vector<4x1xf32>
    %24 = vector.broadcast %23 : vector<4x1xf32> to vector<4x256xf32>
    %25 = arith.addf %21, %24 : vector<4x256xf32>
    %26 = arith.negf %14 : vector<4x256xf32>
    %27 = math.exp %26 : vector<4x256xf32>
    %cst_27 = arith.constant 1.000000e+00 : f32
    %28 = vector.broadcast %cst_27 : f32 to vector<4x256xf32>
    %29 = arith.addf %28, %27 : vector<4x256xf32>
    %30 = arith.divf %28, %29 : vector<4x256xf32>
    %31 = math.tanh %25 : vector<4x256xf32>
    %32 = arith.mulf %30, %31 : vector<4x256xf32>
    %c0_28 = arith.constant 0 : index
    %c0_29 = arith.constant 0 : index
    %c0_30 = arith.constant 0 : index
    %33 = vector.load %arg7[%c0_28, %c0_29, %c0_30] : memref<2x4x4xf32, #tpu.memory_space<vmem>>, vector<1x4x4xf32>
    %34 = vector.shape_cast %33 : vector<1x4x4xf32> to vector<4x4xf32>
    %cst_31 = arith.constant dense<0.000000e+00> : vector<4x256xf32>
    %35 = tpu.matmul %34, %32, %cst_31 {dimension_numbers = #tpu.dot_dimension_numbers<[1], [0], [0], [1], [0, 0, 1, 1], [], []>} : vector<4x4xf32>, vector<4x256xf32>, vector<4x256xf32> -> vector<4x256xf32>
    %c0_32 = arith.constant 0 : index
    %c0_33 = arith.constant 0 : index
    %c0_34 = arith.constant 0 : index
    %36 = vector.load %arg8[%c0_32, %c0_33, %c0_34] : memref<2x4x1xf32, #tpu.memory_space<vmem>>, vector<1x4x1xf32>
    %37 = vector.shape_cast %36 : vector<1x4x1xf32> to vector<4x1xf32>
    %38 = vector.broadcast %37 : vector<4x1xf32> to vector<4x256xf32>
    %39 = arith.addf %35, %38 : vector<4x256xf32>
    %c1_35 = arith.constant 1 : index
    %c0_36 = arith.constant 0 : index
    %c0_37 = arith.constant 0 : index
    %40 = vector.load %arg7[%c1_35, %c0_36, %c0_37] : memref<2x4x4xf32, #tpu.memory_space<vmem>>, vector<1x4x4xf32>
    %41 = vector.shape_cast %40 : vector<1x4x4xf32> to vector<4x4xf32>
    %cst_38 = arith.constant dense<0.000000e+00> : vector<4x256xf32>
    %42 = tpu.matmul %41, %32, %cst_38 {dimension_numbers = #tpu.dot_dimension_numbers<[1], [0], [0], [1], [0, 0, 1, 1], [], []>} : vector<4x4xf32>, vector<4x256xf32>, vector<4x256xf32> -> vector<4x256xf32>
    %c1_39 = arith.constant 1 : index
    %c0_40 = arith.constant 0 : index
    %c0_41 = arith.constant 0 : index
    %43 = vector.load %arg8[%c1_39, %c0_40, %c0_41] : memref<2x4x1xf32, #tpu.memory_space<vmem>>, vector<1x4x1xf32>
    %44 = vector.shape_cast %43 : vector<1x4x1xf32> to vector<4x1xf32>
    %45 = vector.broadcast %44 : vector<4x1xf32> to vector<4x256xf32>
    %46 = arith.addf %42, %45 : vector<4x256xf32>
    %47 = arith.addf %1, %39 : vector<4x256xf32>
    %cst_42 = arith.constant 0.707106769 : f32
    %48 = vector.broadcast %cst_42 : f32 to vector<4x256xf32>
    %49 = arith.mulf %47, %48 : vector<4x256xf32>
    %c0_43 = arith.constant 0 : index
    %c0_44 = arith.constant 0 : index
    %c0_45 = arith.constant 0 : index
    %50 = vector.load %arg9[%c0_43, %c0_44, %c0_45] : memref<1x4x256xf32, #tpu.memory_space<vmem>>, vector<1x4x256xf32>
    %51 = vector.shape_cast %50 : vector<1x4x256xf32> to vector<4x256xf32>
    %52 = vector.shape_cast %49 : vector<4x256xf32> to vector<1x4x256xf32>
    tpu.vector_store %arg9[%c0_43, %c0_44, %c0_45], %52 {strides = array<i32>} : memref<1x4x256xf32, #tpu.memory_space<vmem>>, vector<1x4x256xf32>,
    %c0_46 = arith.constant 0 : index
    %c0_47 = arith.constant 0 : index
    %c0_48 = arith.constant 0 : index
    %53 = vector.load %arg10[%c0_46, %c0_47, %c0_48] : memref<1x4x256xf32, #tpu.memory_space<vmem>>, vector<1x4x256xf32>
    %54 = vector.shape_cast %53 : vector<1x4x256xf32> to vector<4x256xf32>
    %55 = vector.shape_cast %46 : vector<4x256xf32> to vector<1x4x256xf32>
    tpu.vector_store %arg10[%c0_46, %c0_47, %c0_48], %55 {strides = array<i32>} : memref<1x4x256xf32, #tpu.memory_space<vmem>>, vector<1x4x256xf32>,
    return
  }
  func.func @transform_0(%arg0: i32, %arg1: i32) -> (i32, i32, i32) {
    %c0_i32 = arith.constant 0 : i32
    %c0_i32_0 = arith.constant 0 : i32
    return %arg0, %c0_i32, %arg1 : i32, i32, i32
  }
  func.func @transform_1(%arg0: i32, %arg1: i32) -> (i32, i32, i32) {
    %c0_i32 = arith.constant 0 : i32
    %c0_i32_0 = arith.constant 0 : i32
    return %arg0, %c0_i32, %arg1 : i32, i32, i32
  }
  func.func @transform_2(%arg0: i32, %arg1: i32) -> (i32, i32, i32, i32) {
    %c0_i32 = arith.constant 0 : i32
    %c0_i32_0 = arith.constant 0 : i32
    %c0_i32_1 = arith.constant 0 : i32
    %c0_i32_2 = arith.constant 0 : i32
    return %arg0, %c0_i32, %c0_i32_0, %c0_i32_1 : i32, i32, i32, i32
  }
  func.func @transform_3(%arg0: i32, %arg1: i32) -> (i32, i32, i32) {
    %c0_i32 = arith.constant 0 : i32
    %c0_i32_0 = arith.constant 0 : i32
    %c0_i32_1 = arith.constant 0 : i32
    %c0_i32_2 = arith.constant 0 : i32
    return %c0_i32, %c0_i32_0, %c0_i32_1 : i32, i32, i32
  }
  func.func @transform_4(%arg0: i32, %arg1: i32) -> (i32, i32, i32) {
    %c0_i32 = arith.constant 0 : i32
    %c0_i32_0 = arith.constant 0 : i32
    %c0_i32_1 = arith.constant 0 : i32
    %c0_i32_2 = arith.constant 0 : i32
    return %c0_i32, %c0_i32_0, %c0_i32_1 : i32, i32, i32
  }
  func.func @transform_5(%arg0: i32, %arg1: i32) -> (i32, i32, i32) {
    %c0_i32 = arith.constant 0 : i32
    %c0_i32_0 = arith.constant 0 : i32
    %c0_i32_1 = arith.constant 0 : i32
    %c0_i32_2 = arith.constant 0 : i32
    return %c0_i32, %c0_i32_0, %c0_i32_1 : i32, i32, i32
  }
  func.func @transform_6(%arg0: i32, %arg1: i32) -> (i32, i32, i32) {
    %c0_i32 = arith.constant 0 : i32
    %c0_i32_0 = arith.constant 0 : i32
    %c0_i32_1 = arith.constant 0 : i32
    %c0_i32_2 = arith.constant 0 : i32
    return %c0_i32, %c0_i32_0, %c0_i32_1 : i32, i32, i32
  }
  func.func @transform_7(%arg0: i32, %arg1: i32) -> (i32, i32, i32) {
    %c0_i32 = arith.constant 0 : i32
    %c0_i32_0 = arith.constant 0 : i32
    return %arg0, %c0_i32, %arg1 : i32, i32, i32
  }
  func.func @transform_8(%arg0: i32, %arg1: i32) -> (i32, i32, i32) {
    %c0_i32 = arith.constant 0 : i32
    %c0_i32_0 = arith.constant 0 : i32
    return %arg0, %c0_i32, %arg1 : i32, i32, i32
  }
}

</mosaic_0001>

<bundles_post_ra>
// kernel: residual_block_pallas.1
= control target key start
LH: loop header
LB: loop body
LE: loop exit
PB: predicated region body
PF: predicated region fallthrough
CT: control target
= control target key end

     0   :  { %s1276_s27 = smov 0   ;;  %s1278_s28 = smov 0   ;;  %s1369_s0 = inlined_call_operand.vmem [shape: f32[2,4,256], index: 0, kind: input, shape index: {}]   ;;  %s1370_s1 = inlined_call_operand.vmem [shape: f32[2,8,256], index: 1, kind: input, shape index: {}]   ;;  %s1371_s2 = inlined_call_operand.vmem [shape: f32[2,2,4,1], index: 2, kind: input, shape index: {}]   ;;  %s1372_s3 = inlined_call_operand.vmem [shape: f32[2,4,4], index: 3, kind: input, shape index: {}]   ;;  %s1373_s4 = inlined_call_operand.vmem [shape: f32[2,4,8], index: 4, kind: input, shape index: {}]   ;;  %s1374_s5 = inlined_call_operand.vmem [shape: f32[2,4,4], index: 5, kind: input, shape index: {}]   ;;  %s1375_s6 = inlined_call_operand.vmem [shape: f32[2,4,1], index: 6, kind: input, shape index: {}]   ;;  %s1376_s7 = inlined_call_operand.vmem [shape: f32[2,4,256], index: 7, kind: output, shape index: {0}]   ;;  %s1377_s8 = inlined_call_operand.vmem [shape: f32[2,4,256], index: 8, kind: output, shape index: {1}]  }
   0x1   :  { %s1280_s29 = smov 0  }
   0x2 LB: > { %s31_s30 = sadd.s32 1, %s1223_s28  ;;  %p1125_p0 = scmp.ge.s32.totalorder %s1227_s29, 1  ;;  %s1227_s29 = sphi %s1280_s29, %s19_s29   ;;  %s1223_s28 = sphi %s1278_s28, %s1379_s28   ;;  %s1219_s27 = sphi %s1276_s27, %s1378_s27  }
   0x3   : > { %p33_p1 = scmp.ge.s32.totalorder %s31_s30, 2  ;;  %p315_p2 = scmp.lt.s32.totalorder %s1227_s29, 3 }
   0x5   : > { %s1381_s30 = smov (%p33_p1, %s31_s30), 0  ;;  %p316_p3 = pnand %p1125_p0, %p315_p2 }
   0x6   : > { %p381_p4 = scmp.lt.s32.totalorder (!%p316_p3), %s1219_s27, 1 }
   0x7   : > { %319 = sbr.rel (%p316_p3) target bundleno = 460 (0x1cc), region = 48 }
   0xc   : > { %v1229_v0 = vmov 0.0   ;;  %s1383_s27 = smov (!%p381_p4, %s1219_s27), 1  ;;  %v1230_v1 = vmov 0   ;;  %v429_v2 = vld [vmem:[%s1373_s4] sm:$0xf]  ;;  %vm430_vm0 = vcmask 64512  }
   0xd   : > { %498 = vmatprep.mubr.f32.mxu0 %v1229_v0  ;;  %580 = vmatprep.mubr.f32.mxu1 %v1229_v0  ;;  %s1294_s9 = sshll.u32 %s1383_s27, 3  ;;  %s1160_s10 = sshll.u32 %s1383_s27, 4  ;;  %vm511_vm1 = vcmask 1043456   ;;  %v428_v8 = vld [vmem:[%s1372_s3] sm:$0xf]  ;;  %vm507_vm2 = vcmask 31744  }
   0xe   : > { %1190 = vset.pattern.permute.xlu0 %v1230_v1  ;;  %1191 = vset.pattern.permute.xlu1 %v1230_v1  ;;  %s398_s13 = scalar_lea.vmem %s1370_s1, %s1160_s10  ;;  %s388_s18 = scalar_lea.vmem %s1369_s0, %s1294_s9  ;;  %v1141_v9 = vld [vmem:[%s1373_s4 + $0x4] sm:$0xf]  ;;  %v773_v12 = vld [vmem:[%s1375_s6] sm:$0xf] }
   0xf   : > { %v427_v3 = vld [vmem:[%s398_s13 + $0x8] sm:$0xff]  ;;  %v426_v4 = vld [vmem:[%s398_s13] sm:$0xff]  ;;  %s404_s21 = scalar_lea.vmem %s1371_s2, %s1294_s9  ;;  %776 = vperm.xlu1 %1191, %v773_v12   ;;  %s423_s20 = scalar_lea.vmem %s1377_s8, %s1294_s9 }
  0x10   : > { %v1306_v5 = vld [vmem:[%s388_s18] sm:$0xff]  ;;  %464 = vmatprep.subr.mxu0 %v427_v3  ;;  %s413_s23 = scalar_lea.vmem %s1376_s7, %s1294_s9 }
  0x11   : > { %v506_v6 = vcombine.high %v1306_v5, %v1306_v5  ;;  %v587_v7 = vld [vmem:[%s404_s21] sm:$0xf]  ;;  %465 = vmatpush1.msra.mxu0 %v426_v4  ;;  %v1146_v10 = vld [vmem:[%s404_s21 + $0x4] sm:$0xf] }
  0x12   : > { %590 = vperm.xlu0 %1190, %v587_v7   ;;  %1136 = vmatmul.mubr.msk.f32.vlgmr.msra.gmra.mxu0 %vm430_vm0, %v429_v2  ;;  %v1140_v11 = vld [vmem:[%s1372_s3 + $0x4] sm:$0xf]  ;;  %v772_v44 = vld [vmem:[%s1374_s5] sm:$0xf] }
  0x13   : > { %1137 = vmatprep.subr.msk.mxu1 %vm511_vm1, %v506_v6  ;;  %632 = vmatprep.subr.mxu0 %v427_v3  ;;  %v1153_v13 = vld [vmem:[%s1375_s6 + $0x4] sm:$0xf] }
  0x14   : > { %1138 = vmatpush1.msk.msra.mxu1 %vm511_vm1, %v1306_v5  ;;  %633 = vmatpush1.msra.mxu0 %v426_v4  ;;  %v1152_v45 = vld [vmem:[%s1374_s5 + $0x4] sm:$0xf] }
  0x15   : > { %1139 = vmatmul.mubr.msk.f32.vlgmr.msra.gmra.mxu1 %vm507_vm2, %v428_v8  ;;  %1143 = vmatprep.subr.msk.mxu1 %vm511_vm1, %v506_v6 }
  0x16   : > { %666 = vmatprep.mubr.f32.mxu0 %v1229_v0  ;;  %1144 = vmatpush1.msk.msra.mxu1 %vm511_vm1, %v1306_v5 }
  0x17   : > { %740 = vmatprep.mubr.f32.mxu1 %v1229_v0  ;;  %1142 = vmatmul.mubr.msk.f32.vlgmr.msra.gmra.mxu0 %vm430_vm0, %v1141_v9 }
  0x18   : > { %751 = vperm.xlu0 %1190, %v1146_v10   ;;  %852 = vmatprep.mubr.f32.mxu0 %v1229_v0 }
  0x19   : > { %1145 = vmatmul.mubr.msk.f32.vlgmr.msra.gmra.mxu1 %vm507_vm2, %v1140_v11  ;;  %865 = vperm.xlu1 %1191, %v1153_v13  }
  0x1a   : > { %935 = vmatprep.mubr.f32.mxu1 %v1229_v0 }
  0x8a   : > { %v777_v46 = vpop.permute.xlu1 %776 }
  0x8d   : > { %v591_v16 = vpop.permute.xlu0 %590 }
  0x93   : > { %v752_v30 = vpop.permute.xlu0 %751 }
  0x94   : > { %v866_v47 = vpop.permute.xlu1 %865 }
  0xd2   : > { %v500_v14 = vpop.f32.mrf.mxu0 }
  0xd4   : > { %v502_v18 = vpop.f32.mrf.mxu0 }
  0xd5   : > { %v582_v15 = vpop.f32.mrf.mxu1 }
  0xd6   : > { %v583_v17 = vadd.f32 %v582_v15, %v500_v14 }
  0xd7   : > { %v584_v19 = vpop.f32.mrf.mxu1  ;;  %v668_v25 = vpop.f32.mrf.mxu0 }
  0xd8   : > { %v593_v20 = vadd.f32 %v591_v16, %v583_v17  ;;  %v585_v21 = vadd.f32 %v584_v19, %v502_v18 }
  0xd9   : > { %v742_v26 = vpop.f32.mrf.mxu1  ;;  %v670_v27 = vpop.f32.mrf.mxu0 }
  0xda   : > { %v1147_v22 = vmul.f32 -1.442695, %v593_v20  ;;  %v594_v23 = vadd.f32 %v591_v16, %v585_v21  ;;  %v743_v31 = vadd.f32 %v742_v26, %v668_v25 }
  0xdb   : > { %v744_v28 = vpop.f32.mrf.mxu1 }
  0xdc   : > { %1193 = vpow2.f32 %v1147_v22  ;;  %v1148_v24 = vmul.f32 -1.442695, %v594_v23  ;;  %v745_v29 = vadd.f32 %v744_v28, %v670_v27  ;;  %v754_v36 = vadd.f32 %v752_v30, %v743_v31 }
  0xde   : > { %1195 = vpow2.f32 %v1148_v24  ;;  %v755_v32 = vadd.f32 %v752_v30, %v745_v29 }
  0xe0   : > { %1197 = vtanh.f32 %v755_v32 }
  0xe9   : > { %v1194_v33 = vpop.eup %1193 }
  0xea   : > { %v762_v34 = vadd.f32 1.0, %v1194_v33 }
  0xeb   : > { %v1196_v35 = vpop.eup %1195 }
  0xec   : > { %v763_v37 = vadd.f32 1.0, %v1196_v35  ;;  %1199 = vrcp.f32 %v762_v34 }
  0xed   : > { %v1198_v38 = vpop.eup %1197 }
  0xee   : > { %1201 = vrcp.f32 %v763_v37 }
  0xef   : > { %1203 = vtanh.f32 %v754_v36 }
  0xf9   : > { %v1200_v39 = vpop.eup %1199 }
  0xfb   : > { %v1202_v40 = vpop.eup %1201 }
  0xfc   : > { %v1204_v41 = vpop.eup %1203  ;;  %v771_v42 = vmul.f32 %v1202_v40, %v1198_v38 }
  0xfd   : > { %v770_v43 = vmul.f32 %v1204_v41, %v1200_v39 }
  0xfe   : > { %1149 = vmatprep.subr.msk.mxu0 %vm511_vm1, %v771_v42  ;;  %1154 = vmatprep.subr.msk.mxu1 %vm511_vm1, %v771_v42 }
  0xff   : > { %1150 = vmatpush1.msk.msra.mxu0 %vm511_vm1, %v770_v43  ;;  %1155 = vmatpush1.msk.msra.mxu1 %vm511_vm1, %v770_v43 }
 0x100   : > { %1151 = vmatmul.mubr.msk.f32.vlgmr.msra.gmra.mxu0 %vm507_vm2, %v772_v44  ;;  %1156 = vmatmul.mubr.msk.f32.vlgmr.msra.gmra.mxu1 %vm507_vm2, %v1152_v45 }
 0x1c0   : > { %v854_v48 = vpop.f32.mrf.mxu0  ;;  %v937_v49 = vpop.f32.mrf.mxu1 }
 0x1c1   : > { %v938_v50 = vadd.f32 %v937_v49, %v866_v47  ;;  %v855_v53 = vadd.f32 %v854_v48, %v777_v46 }
 0x1c2   : > { %v856_v51 = vpop.f32.mrf.mxu0  ;;  %v939_v52 = vpop.f32.mrf.mxu1 }
 0x1c3   : > { %v857_v54 = vadd.f32 %v856_v51, %v777_v46  ;;  %v940_v55 = vadd.f32 %v939_v52, %v866_v47 }
 0x1c5   : > { %v944_v56 = vcombine.low %v855_v53, %v857_v54  ;;  %v951_v57 = vcombine.low %v938_v50, %v940_v55 }
 0x1c7   : > { %v946_v58 = vadd.f32 %v944_v56, %v1306_v5  ;;  %953 = vst [vmem:[%s423_s20] sm:$0xff] %v951_v57 }
 0x1c9   : > { %v947_v59 = vmul.f32 0.70710677, %v946_v58 }
 0x1cb   : > { %948 = vst [vmem:[%s413_s23] sm:$0xff] %v947_v59 }
 0x1cc PF: > { %s19_s29 = sadd.s32 1, %s1227_s29   ;;  %s1378_s27 = smov %s1223_s28 }
 0x1cd   : > { %p16_p5 = scmp.ge.s32.totalorder %s19_s29, 4   ;;  %s1379_s28 = smov %s1381_s30 }
 0x1cf   :  { %18 = sbr.rel (!%p16_p5) target bundleno = 2 (0x2), region = 101 }

</bundles_post_ra>
